<compile_context>
chip_gen: v5e
topology: v5e:2x2
jax: 0.10.0
libtpu: 0.0.40
codegen_flags: <defaults>
</compile_context>

<pallas_src>
import functools

import jax
import jax.numpy as jnp
from jax.experimental import pallas as pl
from jax.experimental.pallas import tpu as pltpu


def _round_up(x, m):
    return ((x + m - 1) // m) * m


def intent_mlp_kernel(x_ref, w1_ref, b1_ref, w2_ref, b2_ref, w3_ref, b3_ref, o_ref):
    # Layer 1: Linear + bias + ReLU (f32 MXU inputs, f32 accumulate).
    h = jnp.dot(x_ref[...], w1_ref[...], preferred_element_type=jnp.float32)
    h = jnp.maximum(h + b1_ref[...], 0.0)
    # dropout1 = identity (eval mode)

    # Layer 2: Linear + bias + ReLU.
    h = jnp.dot(h, w2_ref[...], preferred_element_type=jnp.float32)
    h = jnp.maximum(h + b2_ref[...], 0.0)
    # dropout2 = identity (eval mode)

    # Output layer: Linear (true out_dim width -> narrow HBM store).
    logits = jnp.dot(h, w3_ref[...], preferred_element_type=jnp.float32) + b3_ref[...]

    # Softmax over dim=1 (feature axis), numerically stabilized, exact normalization.
    m = jnp.max(logits, axis=-1, keepdims=True)
    e = jnp.exp(logits - m)
    denom = jnp.sum(e, axis=-1, keepdims=True)
    o_ref[...] = (e / denom).astype(o_ref.dtype)


@functools.partial(jax.jit, static_argnames=("block_b",))
def intent_model_forward(x, w1, b1, w2, b2, w3, b3, *, block_b=1024):
    """x: [B, input_size] float32. Weights W[in, out] (transposed vs. nn.Linear), biases b[out] or [1, out]."""
    B, in_dim = x.shape
    h1 = w1.shape[1]
    h2 = w2.shape[1]
    out_dim = w3.shape[1]

    b1 = jnp.reshape(b1, (1, h1)).astype(jnp.float32)
    b2 = jnp.reshape(b2, (1, h2)).astype(jnp.float32)
    b3 = jnp.reshape(b3, (1, out_dim)).astype(jnp.float32)
    x = x.astype(jnp.float32)

    # Batch tile: big enough to amortize per-grid-step overhead (~0.35 us), clamped so there
    # are >= 2 blocks when B allows it (v7x has 2 TCs, sharded over the "parallel" axis),
    # and always a multiple of 8 sublanes.
    bb = max(8, min(block_b, _round_up(pl.cdiv(B, 2), 8)))
    n_blocks = pl.cdiv(B, bb)
    b_pad = n_blocks * bb

    # Row-only zero pad of the batch when needed (no feature-dim padding, no dtype cast).
    if b_pad != B:
        x = jnp.pad(x, ((0, b_pad - B), (0, 0)))

    flops = 2 * b_pad * (in_dim * h1 + h1 * h2 + h2 * out_dim)
    transcendentals = b_pad * out_dim  # exp in softmax
    bytes_accessed = (
        b_pad * in_dim * 4           # x read
        + b_pad * out_dim * 4        # output write
        + (in_dim * h1 + h1 * h2 + h2 * out_dim) * 4   # weights (read once)
        + (h1 + h2 + out_dim) * 4    # biases
    )

    out = pl.pallas_call(
        intent_mlp_kernel,
        out_shape=jax.ShapeDtypeStruct((b_pad, out_dim), jnp.float32),
        grid_spec=pltpu.PrefetchScalarGridSpec(
            num_scalar_prefetch=0,
            grid=(n_blocks,),
            in_specs=[
                # batch-tiled activations; last dim equals the full array dim (legal).
                pl.BlockSpec((bb, in_dim), lambda i: (i, 0)),
                # weights / biases: full blocks, constant index map -> resident in VMEM.
                pl.BlockSpec((in_dim, h1), lambda i: (0, 0)),
                pl.BlockSpec((1, h1), lambda i: (0, 0)),
                pl.BlockSpec((h1, h2), lambda i: (0, 0)),
                pl.BlockSpec((1, h2), lambda i: (0, 0)),
                pl.BlockSpec((h2, out_dim), lambda i: (0, 0)),
                pl.BlockSpec((1, out_dim), lambda i: (0, 0)),
            ],
            # Narrow output: last dim equals the full array dim (true out_dim), so we never
            # write padded columns to HBM and no post-kernel column slice is needed.
            out_specs=pl.BlockSpec((bb, out_dim), lambda i: (i, 0)),
        ),
        compiler_params=pltpu.CompilerParams(
            dimension_semantics=("parallel",),
        ),
        cost_estimate=pl.CostEstimate(
            flops=flops,
            transcendentals=transcendentals,
            bytes_accessed=bytes_accessed,
        ),
    )(x, w1, b1, w2, b2, w3, b3)

    # Strip batch padding only if any was added (no-op for divisible B).
    return out if b_pad == B else out[:B]


def _init_linear(key, fan_in, fan_out):
    """Deterministic init mimicking nn.Linear's U(-1/sqrt(fan_in), 1/sqrt(fan_in)).
    Returns W[in, out] (transposed vs. PyTorch) and b[1, out]."""
    kw, kb = jax.random.split(key)
    bound = 1.0 / jnp.sqrt(float(fan_in))
    w = jax.random.uniform(kw, (fan_in, fan_out), jnp.float32, -bound, bound)
    b = jax.random.uniform(kb, (1, fan_out), jnp.float32, -bound, bound)
    return w, b


if __name__ == "__main__":
    # Small shapes consistent with the module's forward:
    # input_size=32, hidden_size1=64, hidden_size2=32, output_size=16, batch=8
    input_size, hidden1, hidden2, output_size = 32, 64, 32, 16
    batch = 8

    root = jax.random.PRNGKey(0)
    kx, k1, k2, k3 = jax.random.split(root, 4)

    x = jax.random.normal(kx, (batch, input_size), jnp.float32)
    w1, b1 = _init_linear(k1, input_size, hidden1)
    w2, b2 = _init_linear(k2, hidden1, hidden2)
    w3, b3 = _init_linear(k3, hidden2, output_size)

    out = intent_model_forward(x, w1, b1, w2, b2, w3, b3)
    out = jax.block_until_ready(out)

    # Reference in plain JAX f32 (eval-mode dropout = identity).
    h = jnp.maximum(x @ w1 + b1, 0.0)
    h = jnp.maximum(h @ w2 + b2, 0.0)
    logits = h @ w3 + b3
    ref = jax.nn.softmax(logits, axis=1)

    assert out.shape == (batch, output_size)
    assert bool(jnp.all(jnp.isfinite(out))), "non-finite values in output"
    assert bool(jnp.allclose(jnp.sum(out, axis=1), 1.0, atol=1e-3)), "softmax rows do not sum to 1"
    assert bool(jnp.allclose(out, ref, atol=2e-2, rtol=0.0)), "mismatch vs f32 reference"

    print("KERNEL_OK")
</pallas_src>

<mosaic_0001>
module attributes {stable_mosaic.version = 11 : i64} {
  func.func @intent_mlp_kernel(%arg0: i32, %arg1: memref<8x32xf32, #tpu.memory_space<vmem>>, %arg2: memref<32x64xf32, #tpu.memory_space<vmem>>, %arg3: memref<1x64xf32, #tpu.memory_space<vmem>>, %arg4: memref<64x32xf32, #tpu.memory_space<vmem>>, %arg5: memref<1x32xf32, #tpu.memory_space<vmem>>, %arg6: memref<32x16xf32, #tpu.memory_space<vmem>>, %arg7: memref<1x16xf32, #tpu.memory_space<vmem>>, %arg8: memref<8x16xf32, #tpu.memory_space<vmem>>) attributes {dimension_semantics = [#tpu.dimension_semantics<parallel>], iteration_bounds = array<i64: 1>, scalar_prefetch = 0 : i64, scratch_operands = 0 : i64, tpu.core_type = #tpu.core_type<tc>, window_params = [{transform_indices = @transform_0, window_bounds = array<i64: 8, 32>}, {pipeline_mode = #tpu.pipeline_mode<synchronous>, transform_indices = @transform_1, window_bounds = array<i64: 32, 64>}, {pipeline_mode = #tpu.pipeline_mode<synchronous>, transform_indices = @transform_2, window_bounds = array<i64: 1, 64>}, {pipeline_mode = #tpu.pipeline_mode<synchronous>, transform_indices = @transform_3, window_bounds = array<i64: 64, 32>}, {pipeline_mode = #tpu.pipeline_mode<synchronous>, transform_indices = @transform_4, window_bounds = array<i64: 1, 32>}, {pipeline_mode = #tpu.pipeline_mode<synchronous>, transform_indices = @transform_5, window_bounds = array<i64: 32, 16>}, {pipeline_mode = #tpu.pipeline_mode<synchronous>, transform_indices = @transform_6, window_bounds = array<i64: 1, 16>}, {transform_indices = @transform_7, window_bounds = array<i64: 8, 16>}]} {
    %c0 = arith.constant 0 : index
    %c0_0 = arith.constant 0 : index
    %0 = vector.load %arg1[%c0, %c0_0] : memref<8x32xf32, #tpu.memory_space<vmem>>, vector<8x32xf32>
    %c0_1 = arith.constant 0 : index
    %c0_2 = arith.constant 0 : index
    %1 = vector.load %arg2[%c0_1, %c0_2] : memref<32x64xf32, #tpu.memory_space<vmem>>, vector<32x64xf32>
    %cst = arith.constant dense<0.000000e+00> : vector<8x64xf32>
    %2 = tpu.matmul %0, %1, %cst {dimension_numbers = #tpu.dot_dimension_numbers<[1], [0], [0], [1], [0, 0, 1, 1], [], []>} : vector<8x32xf32>, vector<32x64xf32>, vector<8x64xf32> -> vector<8x64xf32>
    %c0_3 = arith.constant 0 : index
    %c0_4 = arith.constant 0 : index
    %3 = vector.load %arg3[%c0_3, %c0_4] : memref<1x64xf32, #tpu.memory_space<vmem>>, vector<1x64xf32>
    %4 = vector.broadcast %3 : vector<1x64xf32> to vector<8x64xf32>
    %5 = arith.addf %2, %4 : vector<8x64xf32>
    %cst_5 = arith.constant 0.000000e+00 : f32
    %6 = vector.broadcast %cst_5 : f32 to vector<8x64xf32>
    %7 = arith.maximumf %5, %6 : vector<8x64xf32>
    %c0_6 = arith.constant 0 : index
    %c0_7 = arith.constant 0 : index
    %8 = vector.load %arg4[%c0_6, %c0_7] : memref<64x32xf32, #tpu.memory_space<vmem>>, vector<64x32xf32>
    %cst_8 = arith.constant dense<0.000000e+00> : vector<8x32xf32>
    %9 = tpu.matmul %7, %8, %cst_8 {dimension_numbers = #tpu.dot_dimension_numbers<[1], [0], [0], [1], [0, 0, 1, 1], [], []>} : vector<8x64xf32>, vector<64x32xf32>, vector<8x32xf32> -> vector<8x32xf32>
    %c0_9 = arith.constant 0 : index
    %c0_10 = arith.constant 0 : index
    %10 = vector.load %arg5[%c0_9, %c0_10] : memref<1x32xf32, #tpu.memory_space<vmem>>, vector<1x32xf32>
    %11 = vector.broadcast %10 : vector<1x32xf32> to vector<8x32xf32>
    %12 = arith.addf %9, %11 : vector<8x32xf32>
    %cst_11 = arith.constant 0.000000e+00 : f32
    %13 = vector.broadcast %cst_11 : f32 to vector<8x32xf32>
    %14 = arith.maximumf %12, %13 : vector<8x32xf32>
    %c0_12 = arith.constant 0 : index
    %c0_13 = arith.constant 0 : index
    %15 = vector.load %arg6[%c0_12, %c0_13] : memref<32x16xf32, #tpu.memory_space<vmem>>, vector<32x16xf32>
    %cst_14 = arith.constant dense<0.000000e+00> : vector<8x16xf32>
    %16 = tpu.matmul %14, %15, %cst_14 {dimension_numbers = #tpu.dot_dimension_numbers<[1], [0], [0], [1], [0, 0, 1, 1], [], []>} : vector<8x32xf32>, vector<32x16xf32>, vector<8x16xf32> -> vector<8x16xf32>
    %c0_15 = arith.constant 0 : index
    %c0_16 = arith.constant 0 : index
    %17 = vector.load %arg7[%c0_15, %c0_16] : memref<1x16xf32, #tpu.memory_space<vmem>>, vector<1x16xf32>
    %18 = vector.broadcast %17 : vector<1x16xf32> to vector<8x16xf32>
    %19 = arith.addf %16, %18 : vector<8x16xf32>
    %cst_17 = arith.constant dense<0xFF800000> : vector<8xf32>
    %20 = vector.multi_reduction <maximumf>, %19, %cst_17 [1] : vector<8x16xf32> to vector<8xf32>
    %21 = vector.shape_cast %20 : vector<8xf32> to vector<8x1xf32>
    %22 = vector.broadcast %21 : vector<8x1xf32> to vector<8x16xf32>
    %23 = arith.subf %19, %22 : vector<8x16xf32>
    %24 = math.exp %23 : vector<8x16xf32>
    %cst_18 = arith.constant dense<0.000000e+00> : vector<8xf32>
    %25 = vector.multi_reduction <add>, %24, %cst_18 [1] : vector<8x16xf32> to vector<8xf32>
    %26 = vector.shape_cast %25 : vector<8xf32> to vector<8x1xf32>
    %27 = vector.broadcast %26 : vector<8x1xf32> to vector<8x16xf32>
    %28 = arith.divf %24, %27 : vector<8x16xf32>
    %c0_19 = arith.constant 0 : index
    %c0_20 = arith.constant 0 : index
    %29 = vector.load %arg8[%c0_19, %c0_20] : memref<8x16xf32, #tpu.memory_space<vmem>>, vector<8x16xf32>
    tpu.vector_store %arg8[%c0_19, %c0_20], %28 {strides = array<i32>} : memref<8x16xf32, #tpu.memory_space<vmem>>, vector<8x16xf32>,
    return
  }
  func.func @transform_0(%arg0: i32) -> (i32, i32) {
    %c0_i32 = arith.constant 0 : i32
    %c0_i32_0 = arith.constant 0 : i32
    return %arg0, %c0_i32 : i32, i32
  }
  func.func @transform_1(%arg0: i32) -> (i32, i32) {
    %c0_i32 = arith.constant 0 : i32
    %c0_i32_0 = arith.constant 0 : i32
    %c0_i32_1 = arith.constant 0 : i32
    return %c0_i32, %c0_i32_0 : i32, i32
  }
  func.func @transform_2(%arg0: i32) -> (i32, i32) {
    %c0_i32 = arith.constant 0 : i32
    %c0_i32_0 = arith.constant 0 : i32
    %c0_i32_1 = arith.constant 0 : i32
    return %c0_i32, %c0_i32_0 : i32, i32
  }
  func.func @transform_3(%arg0: i32) -> (i32, i32) {
    %c0_i32 = arith.constant 0 : i32
    %c0_i32_0 = arith.constant 0 : i32
    %c0_i32_1 = arith.constant 0 : i32
    return %c0_i32, %c0_i32_0 : i32, i32
  }
  func.func @transform_4(%arg0: i32) -> (i32, i32) {
    %c0_i32 = arith.constant 0 : i32
    %c0_i32_0 = arith.constant 0 : i32
    %c0_i32_1 = arith.constant 0 : i32
    return %c0_i32, %c0_i32_0 : i32, i32
  }
  func.func @transform_5(%arg0: i32) -> (i32, i32) {
    %c0_i32 = arith.constant 0 : i32
    %c0_i32_0 = arith.constant 0 : i32
    %c0_i32_1 = arith.constant 0 : i32
    return %c0_i32, %c0_i32_0 : i32, i32
  }
  func.func @transform_6(%arg0: i32) -> (i32, i32) {
    %c0_i32 = arith.constant 0 : i32
    %c0_i32_0 = arith.constant 0 : i32
    %c0_i32_1 = arith.constant 0 : i32
    return %c0_i32, %c0_i32_0 : i32, i32
  }
  func.func @transform_7(%arg0: i32) -> (i32, i32) {
    %c0_i32 = arith.constant 0 : i32
    %c0_i32_0 = arith.constant 0 : i32
    return %arg0, %c0_i32 : i32, i32
  }
}

</mosaic_0001>

<bundles_post_ra>
// kernel: intent_model_forward.1
= control target key start
LH: loop header
LB: loop body
LE: loop exit
PB: predicated region body
PF: predicated region fallthrough
CT: control target
= control target key end

     0   :  { %s317_s0 = inlined_call_operand.vmem [shape: f32[8,32], index: 0, kind: input, shape index: {}]   ;;  %s318_s1 = inlined_call_operand.vmem [shape: f32[32,64], index: 1, kind: input, shape index: {}]   ;;  %s319_s2 = inlined_call_operand.vmem [shape: f32[1,64], index: 2, kind: input, shape index: {}]   ;;  %s320_s3 = inlined_call_operand.vmem [shape: f32[64,32], index: 3, kind: input, shape index: {}]   ;;  %s321_s4 = inlined_call_operand.vmem [shape: f32[1,32], index: 4, kind: input, shape index: {}]   ;;  %s322_s5 = inlined_call_operand.vmem [shape: f32[32,16], index: 5, kind: input, shape index: {}]   ;;  %s323_s6 = inlined_call_operand.vmem [shape: f32[1,16], index: 6, kind: input, shape index: {}]   ;;  %s324_s7 = inlined_call_operand.hbm [shape: f32[8,16], index: 7, kind: output, shape index: {}]  }
   0x1   :  { %v31_v0 = vld [vmem:[%s318_s1 + $0x18] sm:$0xff]  ;;  %v30_v1 = vld [vmem:[%s318_s1 + $0x10] sm:$0xff]  ;;  %v29_v3 = vld [vmem:[%s318_s1 + $0x8] sm:$0xff] }
   0x2   :  { %52 = vmatpush.msra.mxu0 %v31_v0  ;;  %v68_v2 = vld [vmem:[%s320_s3 + $0x38] sm:$0xff]  ;;  %v67_v4 = vld [vmem:[%s320_s3 + $0x30] sm:$0xff]  ;;  %v28_v5 = vld [vmem:[%s318_s1] sm:$0xff] }
   0x3   :  { %85 = vmatpush.msra.mxu1 %v68_v2  ;;  %v66_v6 = vld [vmem:[%s320_s3 + $0x28] sm:$0xff] }
   0x4   :  { %53 = vmatpush.msra.mxu0 %v30_v1 }
   0x5   :  { %86 = vmatpush.msra.mxu1 %v67_v4 }
   0x6   :  { %12 = vsyncpa [#allocation3], 0  ;;  %54 = vmatpush.msra.mxu0 %v29_v3  ;;  %v27_v7 = vld [vmem:[%s317_s0] sm:$0xff]  ;;  %vm36_vm0 = vcmask 261120   ;;  %v64_v9 = vld [vmem:[%s320_s3 + $0x18] sm:$0xff]  ;;  %vm73_vm1 = vcmask 523264  }
   0x7   :  { %v65_v8 = vld [vmem:[%s320_s3 + $0x20] sm:$0xff]  ;;  %87 = vmatpush.msra.mxu1 %v66_v6  ;;  %v63_v10 = vld [vmem:[%s320_s3 + $0x10] sm:$0xff]  ;;  %v62_v11 = vld [vmem:[%s320_s3 + $0x8] sm:$0xff]  ;;  %vm129_vm2 = vcmask 130048   ;;  %s162_s15 = sshll.u32 %s324_s7, 4  ;;  %s163_s15 = int_to_ptr.hbm [resolvable:$true] %s162_s15 }
   0x8   :  { %55 = vmatpush.msra.mxu0 %v28_v5  ;;  %v61_v12 = vld [vmem:[%s320_s3] sm:$0xff]  ;;  %v101_v13 = vld [vmem:[%s322_s5 + $0x18] sm:$0xff]  ;;  %v100_v18 = vld [vmem:[%s322_s5 + $0x10] sm:$0xff] }
   0x9   :  { %171 = vmatmul.msk.f32.vlgmr.msra.gmra.mxu0 %vm36_vm0, %v27_v7  ;;  %88 = vmatpush.msra.mxu1 %v65_v8  ;;  %v175_v14 = vld [vmem:[%s319_s2] ss:$0 sm:$0xff]  ;;  %v99_v19 = vld [vmem:[%s322_s5 + $0x8] sm:$0xff] }
   0xa   :  { %121 = vmatpush.msra.mxu2 %v101_v13  ;;  %v98_v20 = vld [vmem:[%s322_s5] sm:$0xff] }
   0xb   :  { %89 = vmatpush.msra.mxu1 %v64_v9  ;;  %v176_v21 = vld [vmem:[%s321_s4] ss:$0 sm:$0xff]  ;;  %s208_s4 = smov [#allocation2]  }
   0xc   :  { %122 = vmatpush.msra.mxu2 %v100_v18  ;;  %v177_v25 = vld [vmem:[%s323_s6] ss:$0 sm:$0xff]  ;;  %s160_s5 = sshll.u32 %s208_s4, 4  ;;  %s161_s5 = int_to_ptr.vmem [resolvable:$true] %s160_s5 }
   0xd   :  { %90 = vmatpush.msra.mxu1 %v63_v10 }
   0xe   :  { %123 = vmatpush.msra.mxu2 %v99_v19 }
   0xf   :  { %91 = vmatpush.msra.mxu1 %v62_v11 }
  0x10   :  { %124 = vmatpush.msra.mxu2 %v98_v20 }
  0x11   :  { %92 = vmatpush.msra.mxu1 %v61_v12 }
  0x86   :  { %v57_v15 = vpop.f32.mrf.mxu0 }
  0x87   :  { %v58_v16 = vadd.f32 %v175_v14, %v57_v15 }
  0x89   :  { %v60_v17 = vmax.f32 %v58_v16, 0.0 }
  0x8b   :  { %172 = vmatmul.msk.f32.vlgmr.msra.gmra.mxu1 %vm73_vm1, %v60_v17 }
 0x108   :  { %v94_v22 = vpop.f32.mrf.mxu1 }
 0x109   :  { %v95_v23 = vadd.f32 %v176_v21, %v94_v22 }
 0x10b   :  { %v97_v24 = vmax.f32 %v95_v23, 0.0 }
 0x10d   :  { %173 = vmatmul.msk.f32.vlgmr.msra.gmra.mxu2 %vm36_vm0, %v97_v24 }
 0x190   :  { %v126_v26 = vpop.f32.mrf.mxu2 }
 0x191   :  { %v127_v27 = vadd.f32 %v177_v25, %v126_v26 }
 0x193   :  { %v130_v28 = vsel %vm129_vm2, %v127_v27, -inf }
 0x194   :  { %131 = vmax.xlane.f32.xlu0 %v130_v28 }
 0x207   :  { %v132_v29 = vpop.xlane.xlu0 %131 }
 0x208   :  { %v133_v30 = vsub.f32 %v127_v27, %v132_v29 }
 0x20a   :  { %v134_v31 = vmul.f32 1.442695, %v133_v30 }
 0x20c   :  { %178 = vpow2.f32 %v134_v31 }
 0x212   :  { %v179_v32 = vpop.eup %178 }
 0x213   :  { %v136_v33 = vsel %vm129_vm2, %v179_v32, 0.0 }
 0x214   :  { %137 = vadd.xlane.f32.xlu0 %v136_v33 }
 0x287   :  { %v138_v34 = vpop.xlane.xlu0 %137 }
 0x288   :  { %180 = vrcp.f32 %v138_v34  ;;  %v150_v38 = vand.u32 2147483648, %v138_v34  ;;  %v148_v40 = vand.u32 2147483647, %v138_v34  ;;  %vm144_vm4 = vweird.f32 %v138_v34 }
 0x28a   :  { %v151_v42 = vor.u32 1.1754944e-38, %v150_v38  ;;  %vm149_vm6 = vcmp.eq.f32.partialorder %v148_v40, 8.507059e+37 }
 0x28e   :  { %v181_v35 = vpop.eup %180 }
 0x28f   :  { %v140_v36 = vmul.f32 %v181_v35, %v138_v34  ;;  %vm145_vm3 = vweird.f32 %v181_v35 }
 0x290   :  { %vm146_vm5 = vmor %vm144_vm4, %vm145_vm3 }
 0x291   :  { %v141_v37 = vsub.f32 1.0, %v140_v36 }
 0x293   :  { %v142_v39 = vmul.f32 %v181_v35, %v141_v37 }
 0x295   :  { %v143_v41 = vadd.f32 %v181_v35, %v142_v39 }
 0x297   :  { %v147_v43 = vsel %vm146_vm5, %v181_v35, %v143_v41 }
 0x298   :  { %v152_v44 = vsel %vm149_vm6, %v151_v42, %v147_v43 }
 0x299   :  { %v153_v45 = vmul.f32 %v179_v32, %v152_v44 }
 0x29b   :  { %154 = vst.msk [vmem:[#allocation2] sm:$0xff] %vm129_vm2, %v153_v45 }
 0x29c   :  { %165 = dma.vmem_to_hbm [thread:$0]  %s161_s5, 128, %s163_s15, [#allocation3]  }
 0x29d   :  { %206 = dma.done.wait [#allocation3], 128  }
 0x29e   :  { %207 = vsyncadd [#allocation3], 4294967168 }
 0x29f   :  { %170 = vsyncpa [#allocation3], 1 }

</bundles_post_ra>
